<compile_context>
chip_gen: v7x
topology: tpu7x:2x2x1
jax: 0.10.0
libtpu: 0.0.40
codegen_flags: <defaults>
</compile_context>

<pallas_src>
import jax
import jax.numpy as jnp
from jax.experimental import pallas as pl
from jax.experimental.pallas import tpu as pltpu


def _round_up(x, m):
    return ((x + m - 1) // m) * m


def _abs_disc_weighted_kernel(x_ref, y_ref, w_ref, o_ref, acc_ref):
    n_id = pl.program_id(1)

    @pl.when(n_id == 0)
    def _():
        acc_ref[...] = jnp.zeros_like(acc_ref)

    diff = jnp.abs(x_ref[...].astype(jnp.float32) - y_ref[...].astype(jnp.float32))
    acc_ref[...] += jnp.sum(diff, axis=0, keepdims=True)

    @pl.when(n_id == pl.num_programs(1) - 1)
    def _():
        # w_ref already carries weight * (1/N): a single multiply per output lane.
        o_ref[...] = (acc_ref[...] * w_ref[...].astype(jnp.float32)).astype(o_ref.dtype)


def _make_unweighted_kernel(inv_n):
    def kernel(x_ref, y_ref, o_ref, acc_ref):
        n_id = pl.program_id(1)

        @pl.when(n_id == 0)
        def _():
            acc_ref[...] = jnp.zeros_like(acc_ref)

        diff = jnp.abs(x_ref[...].astype(jnp.float32) - y_ref[...].astype(jnp.float32))
        acc_ref[...] += jnp.sum(diff, axis=0, keepdims=True)

        @pl.when(n_id == pl.num_programs(1) - 1)
        def _():
            o_ref[...] = (acc_ref[...] * inv_n).astype(o_ref.dtype)

    return kernel


def abs_disc(x, labels, weight_list=None, *, target_tile_n=1024, target_tile_f=1024):
    """Pallas implementation of ABS_disc.forward.

    x, labels: (N, F) float arrays.  weight_list: (F,) or None.
    Returns (F,) = mean(|x - labels| * weight_list, axis=0).
    """
    assert x.shape == labels.shape and x.ndim == 2
    N, F = x.shape
    itemsize = jnp.dtype(x.dtype).itemsize

    # --- tile selection (aligned to the (8, 128) vreg tile) -------------------
    tile_n = _round_up(min(N, target_tile_n), 8)
    tile_f = _round_up(min(F, target_tile_f), 128)

    Fp = _round_up(F, tile_f)
    # Keep >= 2 parallel feature blocks when it costs no extra padding, so both
    # v7x TensorCores get work (harmless on single-TC v5e/v6e).
    if Fp // tile_f < 2 and Fp % 256 == 0 and Fp >= 256:
        tile_f = Fp // 2
    Np = _round_up(N, tile_n)

    # --- zero-pad to tile multiples (zeros contribute 0 to the |x-y| sum) -----
    pad_n, pad_f = Np - N, Fp - F
    if pad_n or pad_f:
        x = jnp.pad(x, ((0, pad_n), (0, pad_f)))
        labels = jnp.pad(labels, ((0, pad_n), (0, pad_f)))

    grid = (Fp // tile_f, Np // tile_n)  # (parallel feature axis, reduction axis last)
    inv_n = 1.0 / float(N)               # mean over the ORIGINAL batch size

    # --- VMEM budget: 2 streaming inputs x 2 pipeline buffers + small extras --
    vmem_bytes = (
        2 * 2 * tile_n * tile_f * itemsize   # x, labels (double-buffered)
        + 2 * 2 * tile_f * itemsize          # weight + output blocks
        + tile_f * 4                         # f32 accumulator scratch
    )
    vmem_limit = min(max(int(vmem_bytes * 1.25) + (2 << 20), 32 << 20), 96 << 20)

    x_spec = pl.BlockSpec((tile_n, tile_f), lambda j, n: (n, j))
    y_spec = pl.BlockSpec((tile_n, tile_f), lambda j, n: (n, j))
    out_spec = pl.BlockSpec((1, tile_f), lambda j, n: (0, j))  # resident across n
    scratch = [pltpu.VMEM((1, tile_f), jnp.float32)]

    if weight_list is None:
        kernel = _make_unweighted_kernel(inv_n)
        in_specs = [x_spec, y_spec]
        operands = (x, labels)
    else:
        w = jnp.asarray(weight_list, dtype=jnp.float32).reshape(-1)
        assert w.shape[0] == F
        if pad_f:
            w = jnp.pad(w, (0, pad_f))
        w2d = (w * inv_n).reshape(1, Fp)  # fold 1/N into the weight, keep f32
        kernel = _abs_disc_weighted_kernel
        in_specs = [x_spec, y_spec, pl.BlockSpec((1, tile_f), lambda j, n: (0, j))]
        operands = (x, labels, w2d)

    out = pl.pallas_call(
        kernel,
        out_shape=jax.ShapeDtypeStruct((1, Fp), x.dtype),
        grid_spec=pltpu.PrefetchScalarGridSpec(
            num_scalar_prefetch=0,
            grid=grid,
            in_specs=in_specs,
            out_specs=out_spec,
            scratch_shapes=scratch,
        ),
        compiler_params=pltpu.CompilerParams(
            dimension_semantics=("parallel", "arbitrary"),
            vmem_limit_bytes=vmem_limit,
        ),
    )(*operands)
    return out.reshape(Fp)[:F]


if __name__ == "__main__":
    key = jax.random.PRNGKey(0)
    kx, kl = jax.random.split(key)

    # Small, deliberately non-aligned shapes to exercise padding + tiling.
    N, F = 10, 200
    x = jax.random.normal(kx, (N, F), dtype=jnp.float32)
    labels = jax.random.normal(kl, (N, F), dtype=jnp.float32)
    weight_list = jnp.linspace(0.5, 1.5, F, dtype=jnp.float32)

    # Weighted path.
    out_w = jax.block_until_ready(abs_disc(x, labels, weight_list))
    ref_w = jnp.mean(jnp.abs(x - labels) * weight_list[None, :], axis=0)
    assert out_w.shape == (F,)
    assert jnp.allclose(out_w, ref_w, atol=1e-5, rtol=1e-5)

    # Unweighted path (weight_list=None: no weight DMA, specialized kernel).
    out_nw = jax.block_until_ready(abs_disc(x, labels, None))
    ref_nw = jnp.mean(jnp.abs(x - labels), axis=0)
    assert out_nw.shape == (F,)
    assert jnp.allclose(out_nw, ref_nw, atol=1e-5, rtol=1e-5)

    print("KERNEL_OK")
</pallas_src>

<mosaic_0001>
module attributes {stable_mosaic.version = 11 : i64} {
  func.func @_abs_disc_weighted_kernel(%arg0: i32, %arg1: i32, %arg2: memref<16x128xf32, #tpu.memory_space<vmem>>, %arg3: memref<16x128xf32, #tpu.memory_space<vmem>>, %arg4: memref<1x128xf32, #tpu.memory_space<vmem>>, %arg5: memref<1x128xf32, #tpu.memory_space<vmem>>, %arg6: memref<1x128xf32, #tpu.memory_space<vmem>>) attributes {dimension_semantics = [#tpu.dimension_semantics<parallel>, #tpu.dimension_semantics<arbitrary>], iteration_bounds = array<i64: 2, 1>, scalar_prefetch = 0 : i64, scratch_operands = 1 : i64, tpu.core_type = #tpu.core_type<tc>, window_params = [{transform_indices = @transform_0, window_bounds = array<i64: 16, 128>}, {transform_indices = @transform_1, window_bounds = array<i64: 16, 128>}, {transform_indices = @transform_2, window_bounds = array<i64: 1, 128>}, {transform_indices = @transform_3, window_bounds = array<i64: 1, 128>}]} {
    %c0_i32 = arith.constant 0 : i32
    %0 = arith.cmpi eq, %arg1, %c0_i32 : i32
    %1 = arith.extui %0 : i1 to i32
    %c0_i32_0 = arith.constant 0 : i32
    %2 = arith.cmpi ne, %1, %c0_i32_0 : i32
    scf.if %2 {
      %cst_10 = arith.constant 0.000000e+00 : f32
      %15 = vector.broadcast %cst_10 : f32 to vector<1x128xf32>
      %c0_11 = arith.constant 0 : index
      %c0_12 = arith.constant 0 : index
      %16 = vector.load %arg6[%c0_11, %c0_12] : memref<1x128xf32, #tpu.memory_space<vmem>>, vector<1x128xf32>
      tpu.vector_store %arg6[%c0_11, %c0_12], %15 {strides = array<i32>} : memref<1x128xf32, #tpu.memory_space<vmem>>, vector<1x128xf32>,
    } else {
    }
    %c0 = arith.constant 0 : index
    %c0_1 = arith.constant 0 : index
    %3 = vector.load %arg2[%c0, %c0_1] : memref<16x128xf32, #tpu.memory_space<vmem>>, vector<16x128xf32>
    %c0_2 = arith.constant 0 : index
    %c0_3 = arith.constant 0 : index
    %4 = vector.load %arg3[%c0_2, %c0_3] : memref<16x128xf32, #tpu.memory_space<vmem>>, vector<16x128xf32>
    %5 = arith.subf %3, %4 : vector<16x128xf32>
    %6 = math.absf %5 : vector<16x128xf32>
    %c0_4 = arith.constant 0 : index
    %c0_5 = arith.constant 0 : index
    %7 = vector.load %arg6[%c0_4, %c0_5] : memref<1x128xf32, #tpu.memory_space<vmem>>, vector<1x128xf32>
    %cst = arith.constant dense<0.000000e+00> : vector<128xf32>
    %8 = vector.multi_reduction <add>, %6, %cst [0] : vector<16x128xf32> to vector<128xf32>
    %9 = vector.shape_cast %8 : vector<128xf32> to vector<1x128xf32>
    %10 = arith.addf %7, %9 : vector<1x128xf32>
    %c0_6 = arith.constant 0 : index
    %c0_7 = arith.constant 0 : index
    %11 = vector.load %arg6[%c0_6, %c0_7] : memref<1x128xf32, #tpu.memory_space<vmem>>, vector<1x128xf32>
    tpu.vector_store %arg6[%c0_6, %c0_7], %10 {strides = array<i32>} : memref<1x128xf32, #tpu.memory_space<vmem>>, vector<1x128xf32>,
    %c0_i32_8 = arith.constant 0 : i32
    %12 = arith.cmpi eq, %arg1, %c0_i32_8 : i32
    %13 = arith.extui %12 : i1 to i32
    %c0_i32_9 = arith.constant 0 : i32
    %14 = arith.cmpi ne, %13, %c0_i32_9 : i32
    scf.if %14 {
      %c0_10 = arith.constant 0 : index
      %c0_11 = arith.constant 0 : index
      %15 = vector.load %arg6[%c0_10, %c0_11] : memref<1x128xf32, #tpu.memory_space<vmem>>, vector<1x128xf32>
      %c0_12 = arith.constant 0 : index
      %c0_13 = arith.constant 0 : index
      %16 = vector.load %arg4[%c0_12, %c0_13] : memref<1x128xf32, #tpu.memory_space<vmem>>, vector<1x128xf32>
      %17 = arith.mulf %15, %16 : vector<1x128xf32>
      %c0_14 = arith.constant 0 : index
      %c0_15 = arith.constant 0 : index
      %18 = vector.load %arg5[%c0_14, %c0_15] : memref<1x128xf32, #tpu.memory_space<vmem>>, vector<1x128xf32>
      tpu.vector_store %arg5[%c0_14, %c0_15], %17 {strides = array<i32>} : memref<1x128xf32, #tpu.memory_space<vmem>>, vector<1x128xf32>,
    } else {
    }
    return
  }
  func.func @transform_0(%arg0: i32, %arg1: i32) -> (i32, i32) {
    %c0_i32 = arith.constant 0 : i32
    return %arg1, %arg0 : i32, i32
  }
  func.func @transform_1(%arg0: i32, %arg1: i32) -> (i32, i32) {
    %c0_i32 = arith.constant 0 : i32
    return %arg1, %arg0 : i32, i32
  }
  func.func @transform_2(%arg0: i32, %arg1: i32) -> (i32, i32) {
    %c0_i32 = arith.constant 0 : i32
    %c0_i32_0 = arith.constant 0 : i32
    return %c0_i32, %arg0 : i32, i32
  }
  func.func @transform_3(%arg0: i32, %arg1: i32) -> (i32, i32) {
    %c0_i32 = arith.constant 0 : i32
    %c0_i32_0 = arith.constant 0 : i32
    return %c0_i32, %arg0 : i32, i32
  }
}

</mosaic_0001>

<bundles_post_ra>
// kernel: tpu_custom_call.1
= control target key start
LH: loop header
LB: loop body
LE: loop exit
PB: predicated region body
PF: predicated region fallthrough
CT: control target
= control target key end

     0   :  { %8 = vsyncpa [#allocation4], 0  ;;  %s915_s0 = inlined_call_operand.hbm [shape: f32[16,256], index: 0, kind: input, shape index: {}]   ;;  %s916_s1 = inlined_call_operand.hbm [shape: f32[16,256], index: 1, kind: input, shape index: {}]   ;;  %s917_s2 = inlined_call_operand.vmem [shape: f32[1,256], index: 2, kind: input, shape index: {}]   ;;  %s918_s3 = inlined_call_operand.hbm [shape: f32[1,256], index: 3, kind: output, shape index: {}]  }
   0x1   :  { %10 = vsyncpa [#allocation4 + $0x1], 0 }
   0x2   :  { %11 = vsyncpa [#allocation7], 0 }
   0x3   :  { %13 = vsyncpa [#allocation7 + $0x1], 0 }
   0x4   :  { %14 = vsyncpa [#allocation5], 0 }
   0x5   :  { %16 = vsyncpa [#allocation5 + $0x1], 0  ;;  %s677_s12 = smov 0   ;;  %s679_s13 = smov 0  }
   0x6   :  { %s681_s14 = smov 0   ;;  %s683_s15 = smov 0  }
   0x7   :  { %s685_s16 = smov 0   ;;  %s687_s17 = smov 0  }
   0x8 LB: > { %s417_s18 = sadd.s32 4294967295, %s648_s17   ;;  %s418_s19 = sadd.s32 4294967294, %s648_s17   ;;  %s648_s17 = sphi %s687_s17, %s22_s17   ;;  %s644_s16 = sphi %s685_s16, %s937_s16   ;;  %s640_s15 = sphi %s683_s15, %s936_s15   ;;  %s636_s14 = sphi %s681_s14, %s935_s14   ;;  %s632_s13 = sphi %s679_s13, %s934_s13   ;;  %s628_s12 = sphi %s677_s12, %s933_s12  }
   0x9   : > { %s34_s20 = sadd.s32 1, %s644_s16  ;;  %s43_s21 = sadd.s32 1, %s636_s14 }
   0xa   : > { %p36_p0 = scmp.ge.s32.totalorder %s34_s20, 2  ;;  %p50_p1 = scmp.ne.s32.totalorder %s636_s14, %s632_s13 }
   0xb   : > { %p51_p2 = scmp.eq.s32.totalorder %s648_s17, 0  ;;  %p56_p3 = scmp.ne.s32.totalorder %s632_s13, %s628_s12 }
   0xc   : > { %s939_s20 = smov (%p36_p0, %s34_s20), 0  ;;  %p57_p5 = scmp.eq.s32.totalorder %s417_s18, 0 }
   0xd   : > { %p718_p4 = por %p51_p2, %p50_p1  ;;  %s39_s23 = ssub.s32 %s644_s16, %s939_s20 }
   0xe   : > { %p134_p6 = scmp.eq.s32.totalorder %s417_s18, 1  ;;  %p41_p7 = scmp.eq.s32.totalorder %s39_s23, 0 }
   0xf   : > { %p724_p8 = por %p57_p5, %p56_p3  ;;  %p140_p10 = scmp.eq.s32.totalorder %s418_s19, 1 }
  0x10   : > { %p728_p9 = por %p134_p6, %p50_p1  ;;  %p448_p13 = scmp.lt.s32.totalorder %s648_s17, 2 }
  0x11   : > { %s923_s24 = scalar_select %p724_p8, 1, 0 }
  0x12   : > { %s924_s25 = scalar_select %p728_p9, 1, 0 }
  0x13   : > { %s733_s26 = scalar_select %p41_p7, %s636_s14, %s43_s21  }
  0x14   : > { %p735_p11 = por %p140_p10, %p56_p3  ;;  %s742_s28 = sand.u32 1, %s636_s14  }
  0x15   : > { %s421_s29 = sshll.u32 %s742_s28, 4  ;;  %s422_s30 = sshll.u32 %s644_s16, 7 }
  0x16   : > { %s925_s27 = scalar_select %p735_p11, 1, 0 }
  0x17   : > { %s751_s6 = scalar_lea.hbm %s915_s0, %s422_s30  ;;  %s164_s7 = scalar_lea.vmem [#allocation3], %s421_s29 }
  0x18   : > { %s173_s8 = sshll.u32 %s164_s7, 4  ;;  %p759_p0 = pnand %p448_p13, %p718_p4  ;;  %s755_s8 = int_to_ptr.vmem [resolvable:$true] %s173_s8 }
  0x19   : > { %s161_s10 = scalar_lea.sflag [#allocation4], %s742_s28  ;;  %s502_s11 = scalar_lea.hbm %s751_s6, 256 }
  0x1a   : > { %p503_p1 = scmp.ne.s32.totalorder %s751_s6, %s502_s11  ;;  %p504_p2 = pneg %p759_p0 }
  0x1b   : > { %s507_s21 = scalar_lea.hbm %s915_s0, 512  ;;  %p508_p4 = scmp.lt.u32.totalorder %s751_s6, %s915_s0 }
  0x1c   : > { %p505_p3 = pnand %p504_p2, %p503_p1  ;;  %p509_p6 = scmp.lt.u32.totalorder %s507_s21, %s502_s11 }
  0x1d   : > { %p511_p10 = scmp.lt.u32.totalorder %s502_s11, %s751_s6 }
  0x1e   : > { %p506_p5 = pneg %p505_p3  ;;  %p510_p7 = por %p509_p6, %p508_p4 }
  0x20   : > { %p512_p13 = por %p511_p10, %p510_p7 }
  0x22   : > { %p513_p12 = pnand %p512_p13, %p506_p5 }
  0x24   : > { %516 = shalt.err (!%p513_p12)
}
  0x25   : > { %s517_s4 = scalar_lea.vmem %s755_s8, 256  ;;  %s650_s5 = smov [#allocation3]  }
  0x26   : > { %p518_p1 = scmp.ne.s32.totalorder %s755_s8, %s517_s4  ;;  %s522_s7 = sshll.u32 %s650_s5, 4  ;;  %s523_s7 = int_to_ptr.vmem [resolvable:$false] %s522_s7 }
  0x27   : > { %s524_s18 = scalar_lea.vmem %s523_s7, 512  ;;  %p525_p9 = scmp.lt.s32.totalorder %s755_s8, %s523_s7 }
  0x28   : > { %p520_p3 = pnand %p518_p1, %p504_p2  ;;  %p526_p4 = scmp.lt.s32.totalorder %s524_s18, %s517_s4 }
  0x2a   : > { %p521_p11 = pneg %p520_p3  ;;  %p527_p6 = por %p526_p4, %p525_p9 }
  0x2c   : > { %p528_p7 = pnand %p527_p6, %p521_p11 }
  0x2e   : > { %531 = shalt.err (!%p528_p7)
}
  0x2f   : > { %s920_s11 = smov 256   ;;  %s652_s19 = smov 128  }
  0x30   : > { %s653_s21 = smov 8   ;;  %p425_p9 = scmp.ge.s32.totalorder %s648_s17, 1 }
  0x31   : > { %440 = dma.hbm_to_vmem [thread:$0]  (!%p759_p0), %s751_s6, 256, %s755_s8, %s161_s10, %s920_s11, %s652_s19, %s653_s21  }
  0x32   : > { %p210_p11 = scmp.lt.s32.totalorder %s648_s17, 3  ;;  %s805_s5 = scalar_lea.hbm %s916_s1, %s422_s30 }
  0x33   : > { %s187_s7 = scalar_lea.vmem [#allocation6], %s421_s29  ;;  %s184_s6 = scalar_lea.sflag [#allocation7], %s742_s28 }
  0x34   : > { %p796_p12 = pnand %p425_p9, %p210_p11  ;;  %s196_s18 = sshll.u32 %s187_s7, 4  ;;  %s809_s18 = int_to_ptr.vmem [resolvable:$true] %s196_s18 }
  0x35   : > { %s532_s8 = scalar_lea.hbm %s805_s5, 256  ;;  %s537_s30 = scalar_lea.hbm %s916_s1, 512 }
  0x36   : > { %p533_p5 = scmp.ne.s32.totalorder %s805_s5, %s532_s8  ;;  %p538_p1 = scmp.lt.u32.totalorder %s805_s5, %s916_s1 }
  0x37   : > { %p539_p3 = scmp.lt.u32.totalorder %s537_s30, %s532_s8  ;;  %p541_p6 = scmp.lt.u32.totalorder %s532_s8, %s805_s5 }
  0x38   : > { %p535_p10 = pnand %p533_p5, %p504_p2 }
  0x39   : > { %p540_p4 = por %p539_p3, %p538_p1 }
  0x3a   : > { %p536_p13 = pneg %p535_p10 }
  0x3b   : > { %p542_p7 = por %p541_p6, %p540_p4 }
  0x3d   : > { %p543_p9 = pnand %p542_p7, %p536_p13 }
  0x3f   : > { %546 = shalt.err (!%p543_p9)
}
  0x40   : > { %s547_s29 = scalar_lea.vmem %s809_s18, 256  ;;  %s654_s7 = smov [#allocation6]  }
  0x41   : > { %p548_p11 = scmp.ne.s32.totalorder %s809_s18, %s547_s29  ;;  %s552_s10 = sshll.u32 %s654_s7, 4  ;;  %s553_s10 = int_to_ptr.vmem [resolvable:$false] %s552_s10 }
  0x42   : > { %s554_s11 = scalar_lea.vmem %s553_s10, 512  ;;  %p555_p8 = scmp.lt.s32.totalorder %s809_s18, %s553_s10 }
  0x43   : > { %p550_p5 = pnand %p548_p11, %p504_p2  ;;  %p556_p1 = scmp.lt.s32.totalorder %s554_s11, %s547_s29 }
  0x45   : > { %p551_p10 = pneg %p550_p5  ;;  %p557_p3 = por %p556_p1, %p555_p8 }
  0x47   : > { %p558_p4 = pnand %p557_p3, %p551_p10 }
  0x49   : > { %561 = shalt.err (!%p558_p4)
}
  0x4a   : > { %s928_s8 = smov 256   ;;  %214 = sbr.rel (%p796_p12) target bundleno = 130 (0x82), region = 32 }
  0x4b   : > { %443 = dma.hbm_to_vmem [thread:$0]  (!%p759_p0), %s805_s5, 256, %s809_s18, %s184_s6, %s928_s8, %s652_s19, %s653_s21  }
  0x4c   : > { %s843_s23 = sand.u32 (!%p796_p12), 1, %s632_s13   ;;  %p929_p8 = scmp.ne.s32.totalorder (!%p796_p12), %s923_s24, 0 }
  0x4d   : > { %s426_s30 = sshll.u32 (!%p796_p12), %s843_s23, 4  ;;  %s217_s4 = scalar_lea.sflag (!%p796_p12), [#allocation4], %s843_s23 }
  0x4e   : > { %s220_s9 = scalar_lea.vmem (!%p796_p12), [#allocation3], %s426_s30 }
  0x51   : > { %615 = dma.done.wait (%p929_p8), %s217_s4, 256  }
  0x52   : > { %617 = vsyncadd (%p929_p8), %s217_s4, 4294967040  ;;  %s226_s28 = scalar_lea.sflag [#allocation7], %s843_s23  ;;  %s229_s19 = scalar_lea.vmem [#allocation6], %s426_s30 }
  0x53   : > { %619 = dma.done.wait (%p929_p8), %s226_s28, 256  }
  0x54   : > { %621 = vsyncadd (%p929_p8), %s226_s28, 4294967040  ;;  %v655_v0 = vmov 0.0   ;;  %v269_v1 = vld [vmem:[%s220_s9] sm:$0xff]  ;;  %v270_v2 = vld [vmem:[%s220_s9 + $0x8] sm:$0xff]  ;;  %p261_p0 = scmp.lt.s32.totalorder %s640_s15, 1  ;;  %s258_s18 = scalar_lea.vmem [#allocation8], %s843_s23 }
  0x55   : > { %268 = vst [vmem:[#allocation2] sm:$0x1] %v655_v0  ;;  %v271_v3 = vld [vmem:[%s229_s19] sm:$0xff]  ;;  %v272_v4 = vld [vmem:[%s229_s19 + $0x8] sm:$0xff]  ;;  %s307_s6 = sshll.u32 %s258_s18, 4  ;;  %s428_s29 = sshll.u32 %s640_s15, 4  ;;  %s863_s6 = int_to_ptr.vmem [resolvable:$true] %s307_s6 }
  0x56   : > { %v273_v5 = vsub.f32 %v269_v1, %v271_v3  ;;  %v274_v6 = vsub.f32 %v270_v2, %v272_v4  ;;  %s262_s24 = scalar_select %p261_p0, %s640_s15, 1 }
  0x57   : > { %s868_s11 = scalar_lea.hbm %s918_s3, %s428_s29  ;;  %s295_s8 = scalar_lea.sflag [#allocation5], %s843_s23 }
  0x58   : > { %v275_v7 = vand.u32 2147483647, %v273_v5  ;;  %v276_v8 = vand.u32 2147483647, %v274_v6  ;;  %s263_s5 = scalar_lea.vmem %s917_s2, %s262_s24  ;;  %s562_s30 = scalar_lea.vmem %s863_s6, 16 }
  0x59   : > { %v291_v18 = vld [vmem:[%s263_s5] sm:$0x1]  ;;  %p563_p2 = scmp.ne.s32.totalorder %s863_s6, %s562_s30  ;;  %p930_p12 = scmp.ne.s32.totalorder %s924_s25, 0 }
  0x5a   : > { %v278_v9 = vadd.f32 %v276_v8, %v275_v7  ;;  %s656_s15 = smov [#allocation8]  }
  0x5b   : > { %p564_p13 = pnand %p563_p2, %p930_p12  ;;  %s566_s4 = sshll.u32 %s656_s15, 4  ;;  %s567_s4 = int_to_ptr.vmem [resolvable:$false] %s566_s4 }
  0x5c   : > { %v279_v10 = vrot.slane %v278_v9, 4  ;;  %v277_v15 = vld [vmem:[#allocation2] sm:$0x1]  ;;  %s568_s9 = scalar_lea.vmem %s567_s4, 32  ;;  %p569_p7 = scmp.lt.s32.totalorder %s863_s6, %s567_s4 }
  0x5d   : > { %p565_p6 = pneg %p564_p13  ;;  %p570_p9 = scmp.lt.s32.totalorder %s568_s9, %s562_s30 }
  0x5e   : > { %v280_v11 = vadd.f32 %v279_v10, %v278_v9 }
  0x5f   : > { %p571_p11 = por %p570_p9, %p569_p7 }
  0x60   : > { %v281_v12 = vrot.slane %v280_v11, 2 }
  0x61   : > { %p572_p5 = pnand %p571_p11, %p565_p6 }
  0x62   : > { %v282_v13 = vadd.f32 %v281_v12, %v280_v11 }
  0x64   : > { %v283_v14 = vrot.slane %v282_v13, 1 }
  0x66   : > { %v284_v16 = vadd.f32 %v283_v14, %v282_v13 }
  0x68   : > { %v285_v17 = vadd.f32 %v284_v16, %v277_v15 }
  0x6a   : > { %286 = vst [vmem:[#allocation2] sm:$0x1] %v285_v17 }
  0x71   : > { %v290_v19 = vld [vmem:[#allocation2] sm:$0x1] }
  0x72   : > { %v292_v20 = vmul.f32 %v291_v18, %v290_v19 }
  0x74   : > { %293 = vst [vmem:[%s258_s18] sm:$0x1] %v292_v20 }
  0x75   : > { %575 = shalt.err (!%p572_p5)
}
  0x76   : > { %s576_s23 = scalar_lea.hbm %s868_s11, 16  ;;  %s580_s24 = scalar_lea.hbm %s918_s3, 32 }
  0x77   : > { %p577_p10 = scmp.ne.s32.totalorder %s868_s11, %s576_s23  ;;  %p581_p4 = scmp.lt.u32.totalorder %s868_s11, %s918_s3 }
  0x78   : > { %p582_p8 = scmp.lt.u32.totalorder %s580_s24, %s576_s23  ;;  %p584_p2 = scmp.lt.u32.totalorder %s576_s23, %s868_s11 }
  0x79   : > { %p578_p1 = pnand %p577_p10, %p930_p12 }
  0x7a   : > { %p583_p0 = por %p582_p8, %p581_p4 }
  0x7b   : > { %p579_p3 = pneg %p578_p1 }
  0x7c   : > { %p585_p13 = por %p584_p2, %p583_p0 }
  0x7e   : > { %p586_p6 = pnand %p585_p13, %p579_p3 }
  0x80   : > { %589 = shalt.err (!%p586_p6)
}
  0x81   : > { %435 = dma.vmem_to_hbm [thread:$0]  (%p930_p12), %s863_s6, 16, %s868_s11, %s295_s8  }
  0x82 PF: > { %s319_s5 = sand.u32 1, %s628_s12   ;;  %p931_p7 = scmp.ne.s32.totalorder %s925_s27, 0 }
  0x83   : > { %p932_p9 = scmp.ge.s32.totalorder %s648_s17, 2  ;;  %s320_s18 = scalar_lea.sflag [#allocation5], %s319_s5 }
  0x85   : > { %p445_p11 = pnand %p932_p9, %p931_p7 }
  0x87   : > { %623 = dma.done.wait (!%p445_p11), %s320_s18, 16  }
  0x88   : > { %625 = vsyncadd (!%p445_p11), %s320_s18, 4294967280  ;;  %s22_s17 = sadd.s32 1, %s648_s17   ;;  %s933_s12 = smov %s632_s13 }
  0x89   : > { %p19_p5 = scmp.ge.s32.totalorder %s22_s17, 4   ;;  %s934_s13 = smov %s636_s14 }
  0x8a   : > { %s935_s14 = smov %s733_s26  ;;  %s936_s15 = smov %s644_s16 }
  0x8b   : > { %s937_s16 = smov %s939_s20  ;;  %21 = sbr.rel (!%p19_p5) target bundleno = 8 (0x8), region = 101 }
  0x92   :  { %324 = vsyncpa [#allocation4], 1 }
  0x93   :  { %326 = vsyncpa [#allocation4 + $0x1], 1 }
  0x94   :  { %327 = vsyncpa [#allocation7], 1 }
  0x95   :  { %329 = vsyncpa [#allocation7 + $0x1], 1 }
  0x96   :  { %330 = vsyncpa [#allocation5], 1 }
  0x97   :  { %332 = vsyncpa [#allocation5 + $0x1], 1 }

</bundles_post_ra>
